<compile_context>
chip_gen: v6e
topology: v6e:2x2x1
jax: 0.10.0
libtpu: 0.0.40
codegen_flags: <defaults>
</compile_context>

<pallas_src>
import functools

import jax
import jax.numpy as jnp
from jax import lax
from jax.experimental import pallas as pl
from jax.experimental.pallas import tpu as pltpu


def _round_up(v, m):
    return (v + m - 1) // m * m


def _choose_row_tile(m, tm_max):
    """Pick (TM, Mp) with TM | Mp and TM a multiple of 8 (or TM == full M)."""
    if m <= tm_max:
        return m, m                      # single block == full dim (legal)
    cap = max(8, (tm_max // 8) * 8)
    divs = [t for t in range(cap, 7, -8) if m % t == 0]
    if divs:
        even = [t for t in divs if (m // t) % 2 == 0]   # v7x: even grid
        return (even[0] if even else divs[0]), m
    # Fallback (rare): pad rows up to a multiple of cap; padded rows give
    # finite values (LayerNorm of the bias) that the caller slices away.
    return cap, _round_up(m, cap)


def _embed_norm_kernel(p_ref, w_ref, b_ref, g_ref, bt_ref, o_ref, *, eps, e):
    # Projection tile: (TM, K) bf16 @ (K, E) bf16 -> f32 accumulation (MXU).
    acc = jnp.dot(p_ref[...], w_ref[...], preferred_element_type=jnp.float32)
    acc = acc + b_ref[...]                              # (1, E) f32 broadcast

    # One-pass LayerNorm statistics in f32.
    inv_e = 1.0 / float(e)
    mean = jnp.sum(acc, axis=-1, keepdims=True) * inv_e
    sumsq = jnp.sum(acc * acc, axis=-1, keepdims=True) * inv_e
    var = jnp.maximum(sumsq - mean * mean, 0.0)
    inv = lax.rsqrt(var + eps)
    o_ref[...] = ((acc - mean) * inv * g_ref[...] + bt_ref[...]).astype(o_ref.dtype)


def _im2col_nhwc(x, kh, kw, stride, pad):
    """NCHW -> (B*Ho*Wo, kh*kw*C) with (kh, kw, C) feature ordering (bf16)."""
    B, C, H, W = x.shape
    xn = x.astype(jnp.bfloat16).transpose(0, 2, 3, 1)          # NHWC, once
    xp = jnp.pad(xn, ((0, 0), (pad, pad), (pad, pad), (0, 0)))
    Ho = (H + 2 * pad - kh) // stride + 1
    Wo = (W + 2 * pad - kw) // stride + 1
    cols = []
    for i in range(kh):
        for j in range(kw):
            cols.append(
                xp[:, i:i + stride * Ho:stride, j:j + stride * Wo:stride, :]
            )  # (B, Ho, Wo, C)
    patches = jnp.concatenate(cols, axis=-1)                   # (B, Ho, Wo, kh*kw*C)
    return patches.reshape(B * Ho * Wo, kh * kw * C), Ho, Wo


def overlap_patch_embed(x, proj_w, proj_b, ln_gamma, ln_beta,
                        *, patch_size=7, stride=4, eps=1e-5,
                        tm_max=1024, out_dtype=jnp.bfloat16):
    """Forward of OverlapPatchEmbed.

    Args:
      x:        (B, C, H, W) float32, NCHW.
      proj_w:   (E, C, kh, kw) conv weight (PyTorch OIHW layout).
      proj_b:   (E,) conv bias.
      ln_gamma: (E,) LayerNorm weight.
      ln_beta:  (E,) LayerNorm bias.
    Returns:
      (tokens, Ho, Wo) with tokens of shape (B, Ho*Wo, E), dtype `out_dtype`.
    """
    B, C, H, W = x.shape
    E = proj_w.shape[0]
    kh = kw = patch_size
    pad = patch_size // 2

    # im2col in bf16 (streamed operand; matmul accumulates in f32).
    patches, Ho, Wo = _im2col_nhwc(x, kh, kw, stride, pad)
    M, K = patches.shape

    TM, Mp = _choose_row_tile(M, tm_max)
    if Mp != M:
        patches = jnp.pad(patches, ((0, Mp - M), (0, 0)))

    # Weight reordered to the (kh, kw, C) feature layout of the patches; small.
    w2d = proj_w.transpose(2, 3, 1, 0).reshape(K, E).astype(jnp.bfloat16)
    b2d = proj_b.astype(jnp.float32).reshape(1, E)
    g2d = ln_gamma.astype(jnp.float32).reshape(1, E)
    bt2d = ln_beta.astype(jnp.float32).reshape(1, E)

    kernel = functools.partial(_embed_norm_kernel, eps=eps, e=E)

    out = pl.pallas_call(
        kernel,
        out_shape=jax.ShapeDtypeStruct((Mp, E), out_dtype),
        grid=(Mp // TM,),
        in_specs=[
            pl.BlockSpec((TM, K), lambda i: (i, 0)),   # patches tile (streamed)
            pl.BlockSpec((K, E), lambda i: (0, 0)),    # weights (resident)
            pl.BlockSpec((1, E), lambda i: (0, 0)),    # conv bias
            pl.BlockSpec((1, E), lambda i: (0, 0)),    # LN gamma
            pl.BlockSpec((1, E), lambda i: (0, 0)),    # LN beta
        ],
        out_specs=pl.BlockSpec((TM, E), lambda i: (i, 0)),
        compiler_params=pltpu.CompilerParams(
            dimension_semantics=("parallel",),
        ),
    )(patches, w2d, b2d, g2d, bt2d)

    if Mp != M:
        out = out[:M]
    tokens = out.reshape(B, Ho * Wo, E)
    return tokens, Ho, Wo


def _reference(x, proj_w, proj_b, ln_gamma, ln_beta, *, stride, pad, eps):
    """Pure-JAX f32 reference (Conv2d + flatten/transpose + LayerNorm)."""
    y = lax.conv_general_dilated(
        x, proj_w, window_strides=(stride, stride),
        padding=((pad, pad), (pad, pad)),
        dimension_numbers=("NCHW", "OIHW", "NCHW"))
    y = y + proj_b.reshape(1, -1, 1, 1)
    B, E, Ho, Wo = y.shape
    t = y.reshape(B, E, Ho * Wo).transpose(0, 2, 1)           # (B, N, E)
    mean = t.mean(-1, keepdims=True)
    var = ((t - mean) ** 2).mean(-1, keepdims=True)
    t = (t - mean) * lax.rsqrt(var + eps) * ln_gamma + ln_beta
    return t, Ho, Wo


if __name__ == "__main__":
    # Small, module-consistent shapes: batch=2, in_chans=4, img 16x16,
    # patch_size=7, stride=4  ->  Ho = Wo = 4, embed_dim=32.
    B, C, H, W = 2, 4, 16, 16
    E = 32
    patch_size, stride = 7, 4
    pad = patch_size // 2
    eps = 1e-5

    key = jax.random.PRNGKey(0)
    kx, kw_, kb = jax.random.split(key, 3)

    x = jax.random.normal(kx, (B, C, H, W), dtype=jnp.float32)
    proj_w = jax.random.normal(kw_, (E, C, patch_size, patch_size),
                               dtype=jnp.float32) * 0.02
    proj_b = jax.random.normal(kb, (E,), dtype=jnp.float32) * 0.02
    ln_gamma = jnp.ones((E,), dtype=jnp.float32)   # PyTorch LayerNorm default
    ln_beta = jnp.zeros((E,), dtype=jnp.float32)

    tokens, Ho, Wo = overlap_patch_embed(
        x, proj_w, proj_b, ln_gamma, ln_beta,
        patch_size=patch_size, stride=stride, eps=eps)
    tokens = jax.block_until_ready(tokens)

    assert tokens.shape == (B, Ho * Wo, E), tokens.shape
    assert tokens.dtype == jnp.bfloat16, tokens.dtype

    ref, Ho_r, Wo_r = _reference(x, proj_w, proj_b, ln_gamma, ln_beta,
                                 stride=stride, pad=pad, eps=eps)
    assert (Ho, Wo) == (Ho_r, Wo_r)
    max_err = float(jnp.max(jnp.abs(tokens.astype(jnp.float32) - ref)))
    # bf16 projection + bf16 output vs f32 reference: generous but meaningful.
    assert max_err < 0.15, f"max abs error vs reference: {max_err}"

    print("KERNEL_OK")
</pallas_src>

<mosaic_0001>
module attributes {stable_mosaic.version = 11 : i64} {
  func.func @_embed_norm_kernel(%arg0: i32, %arg1: memref<32x196xbf16, #tpu.memory_space<vmem>>, %arg2: memref<196x32xbf16, #tpu.memory_space<vmem>>, %arg3: memref<1x32xf32, #tpu.memory_space<vmem>>, %arg4: memref<1x32xf32, #tpu.memory_space<vmem>>, %arg5: memref<1x32xf32, #tpu.memory_space<vmem>>, %arg6: memref<32x32xbf16, #tpu.memory_space<vmem>>) attributes {dimension_semantics = [#tpu.dimension_semantics<parallel>], iteration_bounds = array<i64: 1>, scalar_prefetch = 0 : i64, scratch_operands = 0 : i64, tpu.core_type = #tpu.core_type<tc>, window_params = [{transform_indices = @transform_0, window_bounds = array<i64: 32, 196>}, {pipeline_mode = #tpu.pipeline_mode<synchronous>, transform_indices = @transform_1, window_bounds = array<i64: 196, 32>}, {pipeline_mode = #tpu.pipeline_mode<synchronous>, transform_indices = @transform_2, window_bounds = array<i64: 1, 32>}, {pipeline_mode = #tpu.pipeline_mode<synchronous>, transform_indices = @transform_3, window_bounds = array<i64: 1, 32>}, {pipeline_mode = #tpu.pipeline_mode<synchronous>, transform_indices = @transform_4, window_bounds = array<i64: 1, 32>}, {transform_indices = @transform_5, window_bounds = array<i64: 32, 32>}]} {
    %c0 = arith.constant 0 : index
    %c0_0 = arith.constant 0 : index
    %0 = vector.load %arg1[%c0, %c0_0] : memref<32x196xbf16, #tpu.memory_space<vmem>>, vector<32x196xbf16>
    %c0_1 = arith.constant 0 : index
    %c0_2 = arith.constant 0 : index
    %1 = vector.load %arg2[%c0_1, %c0_2] : memref<196x32xbf16, #tpu.memory_space<vmem>>, vector<196x32xbf16>
    %cst = arith.constant dense<0.000000e+00> : vector<32x32xf32>
    %2 = tpu.matmul %0, %1, %cst {dimension_numbers = #tpu.dot_dimension_numbers<[1], [0], [0], [1], [0, 0, 1, 1], [], []>} : vector<32x196xbf16>, vector<196x32xbf16>, vector<32x32xf32> -> vector<32x32xf32>
    %c0_3 = arith.constant 0 : index
    %c0_4 = arith.constant 0 : index
    %3 = vector.load %arg3[%c0_3, %c0_4] : memref<1x32xf32, #tpu.memory_space<vmem>>, vector<1x32xf32>
    %4 = vector.broadcast %3 : vector<1x32xf32> to vector<32x32xf32>
    %5 = arith.addf %2, %4 : vector<32x32xf32>
    %cst_5 = arith.constant dense<0.000000e+00> : vector<32xf32>
    %6 = vector.multi_reduction <add>, %5, %cst_5 [1] : vector<32x32xf32> to vector<32xf32>
    %7 = vector.shape_cast %6 : vector<32xf32> to vector<32x1xf32>
    %cst_6 = arith.constant 3.125000e-02 : f32
    %8 = vector.broadcast %cst_6 : f32 to vector<32x1xf32>
    %9 = arith.mulf %7, %8 : vector<32x1xf32>
    %10 = arith.mulf %5, %5 : vector<32x32xf32>
    %cst_7 = arith.constant dense<0.000000e+00> : vector<32xf32>
    %11 = vector.multi_reduction <add>, %10, %cst_7 [1] : vector<32x32xf32> to vector<32xf32>
    %12 = vector.shape_cast %11 : vector<32xf32> to vector<32x1xf32>
    %cst_8 = arith.constant 3.125000e-02 : f32
    %13 = vector.broadcast %cst_8 : f32 to vector<32x1xf32>
    %14 = arith.mulf %12, %13 : vector<32x1xf32>
    %15 = arith.mulf %9, %9 : vector<32x1xf32>
    %16 = arith.subf %14, %15 : vector<32x1xf32>
    %cst_9 = arith.constant 0.000000e+00 : f32
    %17 = vector.broadcast %cst_9 : f32 to vector<32x1xf32>
    %18 = arith.maximumf %16, %17 : vector<32x1xf32>
    %cst_10 = arith.constant 9.99999974E-6 : f32
    %19 = vector.broadcast %cst_10 : f32 to vector<32x1xf32>
    %20 = arith.addf %18, %19 : vector<32x1xf32>
    %21 = math.rsqrt %20 : vector<32x1xf32>
    %22 = vector.broadcast %9 : vector<32x1xf32> to vector<32x32xf32>
    %23 = arith.subf %5, %22 : vector<32x32xf32>
    %24 = vector.broadcast %21 : vector<32x1xf32> to vector<32x32xf32>
    %25 = arith.mulf %23, %24 : vector<32x32xf32>
    %c0_11 = arith.constant 0 : index
    %c0_12 = arith.constant 0 : index
    %26 = vector.load %arg4[%c0_11, %c0_12] : memref<1x32xf32, #tpu.memory_space<vmem>>, vector<1x32xf32>
    %27 = vector.broadcast %26 : vector<1x32xf32> to vector<32x32xf32>
    %28 = arith.mulf %25, %27 : vector<32x32xf32>
    %c0_13 = arith.constant 0 : index
    %c0_14 = arith.constant 0 : index
    %29 = vector.load %arg5[%c0_13, %c0_14] : memref<1x32xf32, #tpu.memory_space<vmem>>, vector<1x32xf32>
    %30 = vector.broadcast %29 : vector<1x32xf32> to vector<32x32xf32>
    %31 = arith.addf %28, %30 : vector<32x32xf32>
    %32 = arith.truncf %31 : vector<32x32xf32> to vector<32x32xbf16>
    %c0_15 = arith.constant 0 : index
    %c0_16 = arith.constant 0 : index
    %33 = vector.load %arg6[%c0_15, %c0_16] : memref<32x32xbf16, #tpu.memory_space<vmem>>, vector<32x32xbf16>
    tpu.vector_store %arg6[%c0_15, %c0_16], %32 {strides = array<i32>} : memref<32x32xbf16, #tpu.memory_space<vmem>>, vector<32x32xbf16>,
    return
  }
  func.func @transform_0(%arg0: i32) -> (i32, i32) {
    %c0_i32 = arith.constant 0 : i32
    %c0_i32_0 = arith.constant 0 : i32
    return %arg0, %c0_i32 : i32, i32
  }
  func.func @transform_1(%arg0: i32) -> (i32, i32) {
    %c0_i32 = arith.constant 0 : i32
    %c0_i32_0 = arith.constant 0 : i32
    %c0_i32_1 = arith.constant 0 : i32
    return %c0_i32, %c0_i32_0 : i32, i32
  }
  func.func @transform_2(%arg0: i32) -> (i32, i32) {
    %c0_i32 = arith.constant 0 : i32
    %c0_i32_0 = arith.constant 0 : i32
    %c0_i32_1 = arith.constant 0 : i32
    return %c0_i32, %c0_i32_0 : i32, i32
  }
  func.func @transform_3(%arg0: i32) -> (i32, i32) {
    %c0_i32 = arith.constant 0 : i32
    %c0_i32_0 = arith.constant 0 : i32
    %c0_i32_1 = arith.constant 0 : i32
    return %c0_i32, %c0_i32_0 : i32, i32
  }
  func.func @transform_4(%arg0: i32) -> (i32, i32) {
    %c0_i32 = arith.constant 0 : i32
    %c0_i32_0 = arith.constant 0 : i32
    %c0_i32_1 = arith.constant 0 : i32
    return %c0_i32, %c0_i32_0 : i32, i32
  }
  func.func @transform_5(%arg0: i32) -> (i32, i32) {
    %c0_i32 = arith.constant 0 : i32
    %c0_i32_0 = arith.constant 0 : i32
    return %arg0, %c0_i32 : i32, i32
  }
}

</mosaic_0001>

<bundles_post_ra>
// kernel: tpu_custom_call.1
= control target key start
LH: loop header
LB: loop body
LE: loop exit
PB: predicated region body
PF: predicated region fallthrough
CT: control target
= control target key end

     0   :  { %v444_v1 = vmov 0   ;;  %vm151_vm0 = vcmask 556032   ;;  %s603_s0 = inlined_call_operand.vmem [shape: bf16[32,196], index: 0, kind: input, shape index: {}]   ;;  %s604_s1 = inlined_call_operand.vmem [shape: bf16[196,32], index: 1, kind: input, shape index: {}]   ;;  %s605_s2 = inlined_call_operand.vmem [shape: f32[1,32], index: 2, kind: input, shape index: {}]   ;;  %s606_s3 = inlined_call_operand.vmem [shape: f32[1,32], index: 3, kind: input, shape index: {}]   ;;  %s607_s4 = inlined_call_operand.vmem [shape: f32[1,32], index: 4, kind: input, shape index: {}]   ;;  %s608_s5 = inlined_call_operand.hbm [shape: bf16[32,32], index: 5, kind: output, shape index: {}]  }
   0x1   :  { %v395_v0 = vld [vmem:[%s604_s1 + $0x38] sm:$0xff]   ;;  %162 = vmatprep.subr.bf16.mxu0 %v444_v1  ;;  %365 = vmatprep.subr.bf16.mxu1 %v444_v1  ;;  %v396_v2 = vld [vmem:[%s604_s1 + $0x30] sm:$0xff]   ;;  %v397_v3 = vld [vmem:[%s604_s1 + $0x28] sm:$0xff]  }
   0x2   :  { %163 = vmatpush1.bf16.msra.mxu0 %v395_v0  ;;  %378 = vmatpush1.bf16.msra.mxu1 %v395_v0  ;;  %v398_v4 = vld [vmem:[%s604_s1 + $0x20] sm:$0xff]   ;;  %v399_v6 = vld [vmem:[%s604_s1 + $0x18] sm:$0xff]  }
   0x3   :  { %164 = vmatprep.subr.bf16.mxu0 %v444_v1  ;;  %366 = vmatprep.subr.bf16.mxu1 %v444_v1  ;;  %v410_v5 = vld [vmem:[%s603_s0 + $0x4] ss:$8 sps:$4 sm:$0xff]   ;;  %v413_v7 = vld [vmem:[%s603_s0 + $0x14] ss:$8 sps:$4 sm:$0xff]  }
   0x6   :  { %165 = vmatpush1.bf16.msra.mxu0 %v396_v2  ;;  %379 = vmatpush1.bf16.msra.mxu1 %v396_v2 }
   0x7   :  { %166 = vmatprep.subr.bf16.mxu0 %v444_v1  ;;  %367 = vmatprep.subr.bf16.mxu1 %v444_v1 }
   0xa   :  { %167 = vmatpush1.bf16.msra.mxu0 %v397_v3  ;;  %380 = vmatpush1.bf16.msra.mxu1 %v397_v3 }
   0xb   :  { %168 = vmatprep.subr.bf16.mxu0 %v444_v1  ;;  %368 = vmatprep.subr.bf16.mxu1 %v444_v1 }
   0xe   :  { %169 = vmatpush1.bf16.msra.mxu0 %v398_v4  ;;  %381 = vmatpush1.bf16.msra.mxu1 %v398_v4 }
   0xf   :  { %170 = vmatprep.subr.bf16.mxu0 %v444_v1  ;;  %369 = vmatprep.subr.bf16.mxu1 %v444_v1 }
  0x10   :  { %10 = vsyncpa [#allocation3], 0  ;;  %353 = vmatprep.mubr.msk.bf16.mxu0 %vm151_vm0, %v410_v5  ;;  %354 = vmatprep.mubr.msk.bf16.mxu1 %vm151_vm0, %v413_v7  ;;  %v400_v8 = vld [vmem:[%s604_s1 + $0x10] sm:$0xff]   ;;  %v401_v9 = vld [vmem:[%s604_s1 + $0x8] sm:$0xff]   ;;  %vm158_vm1 = vcmask 1041408   ;;  %vm211_vm2 = vcmask 261120  }
  0x11   :  { %v402_v10 = vld [vmem:[%s604_s1] sm:$0xff]   ;;  %v404_v13 = vld [vmem:[%s604_s1 + $0x58] sm:$0xff]   ;;  %v405_v14 = vld [vmem:[%s604_s1 + $0x50] sm:$0xff]   ;;  %vm314_vm3 = vcmask 257024  }
  0x12   :  { %171 = vmatpush1.bf16.msra.mxu0 %v399_v6  ;;  %382 = vmatpush1.bf16.msra.mxu1 %v399_v6  ;;  %v403_v11 = vld [vmem:[%s604_s1 + $0x60] ss:$0 sps:$4 sm:$0x33]   ;;  %v406_v15 = vld [vmem:[%s604_s1 + $0x48] sm:$0xff]   ;;  %v411_v18 = vld [vmem:[%s603_s0 + $0x10] ss:$8 sps:$4 sm:$0xff]  }
  0x13   :  { %172 = vmatprep.subr.bf16.mxu0 %v444_v1  ;;  %370 = vmatprep.subr.bf16.mxu1 %v444_v1  ;;  %v160_v12 = vsel %vm158_vm1, %v403_v11, 0  ;;  %v407_v16 = vld [vmem:[%s604_s1 + $0x40] sm:$0xff]  }
  0x14   :  { %v408_v17 = vld [vmem:[%s603_s0] ss:$8 sps:$4 sm:$0xff]  }
  0x15   :  { %v335_v19 = vld [vmem:[%s605_s2] ss:$0 sm:$0xff] }
  0x16   :  { %173 = vmatpush1.bf16.msra.mxu0 %v400_v8  ;;  %383 = vmatpush1.bf16.msra.mxu1 %v400_v8 }
  0x17   :  { %174 = vmatprep.subr.bf16.mxu0 %v444_v1  ;;  %371 = vmatprep.subr.bf16.mxu1 %v444_v1 }
  0x1a   :  { %175 = vmatpush1.bf16.msra.mxu0 %v401_v9  ;;  %384 = vmatpush1.bf16.msra.mxu1 %v401_v9 }
  0x1b   :  { %176 = vmatprep.subr.bf16.mxu0 %v444_v1  ;;  %372 = vmatprep.subr.bf16.mxu1 %v444_v1 }
  0x1e   :  { %177 = vmatpush1.bf16.msra.mxu0 %v402_v10  ;;  %385 = vmatpush1.bf16.msra.mxu1 %v402_v10 }
  0x1f   :  { %184 = vmatprep.subr.bf16.mxu0 %v444_v1  ;;  %373 = vmatprep.subr.bf16.mxu1 %v444_v1 }
  0x22   :  { %185 = vmatpush2.bf16.msra.mxu0 %v160_v12  ;;  %386 = vmatpush2.bf16.msra.mxu1 %v160_v12 }
  0x23   :  { %186 = vmatprep.subr.bf16.mxu0 %v444_v1  ;;  %374 = vmatprep.subr.bf16.mxu1 %v444_v1 }
  0x26   :  { %187 = vmatpush2.bf16.msra.mxu0 %v404_v13  ;;  %387 = vmatpush2.bf16.msra.mxu1 %v404_v13 }
  0x27   :  { %188 = vmatprep.subr.bf16.mxu0 %v444_v1  ;;  %375 = vmatprep.subr.bf16.mxu1 %v444_v1 }
  0x2a   :  { %189 = vmatpush2.bf16.msra.mxu0 %v405_v14  ;;  %388 = vmatpush2.bf16.msra.mxu1 %v405_v14  ;;  %v355_v14 = vld [vmem:[%s606_s3] ss:$0 sm:$0xff]  ;;  %s445_s3 = smov [#allocation2]  }
  0x2b   :  { %190 = vmatprep.subr.bf16.mxu0 %v444_v1  ;;  %376 = vmatprep.subr.bf16.mxu1 %v444_v1 }
  0x2e   :  { %191 = vmatpush2.bf16.msra.mxu0 %v406_v15  ;;  %389 = vmatpush2.bf16.msra.mxu1 %v406_v15 }
  0x2f   :  { %192 = vmatprep.subr.bf16.mxu0 %v444_v1  ;;  %377 = vmatprep.subr.bf16.mxu1 %v444_v1 }
  0x32   :  { %193 = vmatpush2.bf16.msra.mxu0 %v407_v16  ;;  %390 = vmatpush2.bf16.msra.mxu1 %v407_v16  ;;  %v356_v16 = vld [vmem:[%s607_s4] ss:$0 sm:$0xff]  ;;  %s324_s4 = sshll.u32 %s445_s3, 4  ;;  %s325_s4 = int_to_ptr.vmem [resolvable:$true] %s324_s4 }
  0x33   :  { %s422_s30 = scalar_lea.vmem %s325_s4, 256  ;;  %p427_p1 = scmp.lt.s32.totalorder %s325_s4, %s325_s4 }
  0x34   :  { %p423_p0 = scmp.ne.s32.totalorder %s325_s4, %s422_s30  ;;  %p428_p2 = scmp.lt.s32.totalorder %s422_s30, %s422_s30 }
  0x35   :  { %195 = vmatmul.mubr.bf16.vlgmr.msra.gmra.mxu0 %v408_v17  ;;  %203 = vmatmul.mubr.bf16.vlgmr.msra.gmra.mxu1 %v411_v18 }
  0x36   :  { %p429_p3 = por %p428_p2, %p427_p1 }
  0x38   :  { %p430_p4 = pnand %p429_p3, %p423_p0 }
  0xf5   :  { %v196_v20 = vpop.f32.mrf.mxu0  ;;  %v204_v21 = vpop.f32.mrf.mxu1 }
  0xf6   :  { %v558_v22 = vadd.f32 %v335_v19, %v196_v20  ;;  %v560_v23 = vadd.f32 %v335_v19, %v204_v21 }
  0xf7   :  { %v198_v24 = vpop.f32.mrf.mxu0  ;;  %v206_v25 = vpop.f32.mrf.mxu1 }
  0xf8   :  { %v218_v26 = vsel %vm211_vm2, %v560_v23, 0.0  ;;  %v212_v27 = vsel %vm211_vm2, %v558_v22, 0.0  ;;  %v228_v28 = vmul.f32 %v558_v22, %v558_v22  ;;  %v230_v41 = vmul.f32 %v560_v23, %v560_v23 }
  0xf9   :  { %v207_v29 = vpop.f32.mrf.mxu1  ;;  %219 = vadd.xlane.f32.xlu1 %v218_v26  ;;  %v199_v30 = vpop.f32.mrf.mxu0  ;;  %213 = vadd.xlane.f32.xlu0 %v212_v27 }
  0xfa   :  { %v568_v31 = vadd.f32 %v335_v19, %v207_v29  ;;  %v570_v32 = vadd.f32 %v335_v19, %v199_v30  ;;  %v232_v36 = vsel %vm211_vm2, %v228_v28, 0.0  ;;  %v238_v43 = vsel %vm211_vm2, %v230_v41, 0.0 }
  0xfb   :  { %v201_v33 = vpop.f32.mrf.mxu0  ;;  %v209_v34 = vpop.f32.mrf.mxu1 }
  0xfc   :  { %v221_v35 = vsel %vm211_vm2, %v568_v31, 0.0  ;;  %v229_v37 = vmul.f32 %v570_v32, %v570_v32  ;;  %v215_v39 = vsel %vm211_vm2, %v570_v32, 0.0  ;;  %v231_v40 = vmul.f32 %v568_v31, %v568_v31 }
  0xfd   :  { %222 = vadd.xlane.f32.xlu1 %v221_v35  ;;  %233 = vadd.xlane.f32.xlu0 %v232_v36 }
  0xfe   :  { %v235_v38 = vsel %vm211_vm2, %v229_v37, 0.0  ;;  %v241_v42 = vsel %vm211_vm2, %v231_v40, 0.0 }
 0x101   :  { %236 = vadd.xlane.f32.xlu1 %v235_v38  ;;  %216 = vadd.xlane.f32.xlu0 %v215_v39 }
 0x105   :  { %242 = vadd.xlane.f32.xlu1 %v241_v42  ;;  %239 = vadd.xlane.f32.xlu0 %v238_v43 }
 0x182   :  { %v220_v44 = vpop.xlane.xlu1 %219  ;;  %v214_v45 = vpop.xlane.xlu0 %213 }
 0x183   :  { %v224_v46 = vmul.f32 0.03125, %v214_v45  ;;  %v226_v52 = vmul.f32 0.03125, %v220_v44 }
 0x185   :  { %v248_v49 = vmul.f32 %v224_v46, %v224_v46  ;;  %v250_v61 = vmul.f32 %v226_v52, %v226_v52  ;;  %v268_v12 = vsub.f32 %v558_v22, %v224_v46  ;;  %v270_v26 = vsub.f32 %v560_v23, %v226_v52 }
 0x186   :  { %v223_v47 = vpop.xlane.xlu1 %222  ;;  %v234_v48 = vpop.xlane.xlu0 %233 }
 0x187   :  { %v244_v50 = vmul.f32 0.03125, %v234_v48  ;;  %v227_v53 = vmul.f32 0.03125, %v223_v47 }
 0x189   :  { %v252_v51 = vsub.f32 %v244_v50, %v248_v49  ;;  %v251_v62 = vmul.f32 %v227_v53, %v227_v53  ;;  %v271_v21 = vsub.f32 %v568_v31, %v227_v53 }
 0x18a   :  { %v237_v54 = vpop.xlane.xlu1 %236  ;;  %v217_v55 = vpop.xlane.xlu0 %216 }
 0x18b   :  { %v256_v56 = vmax.f32 %v252_v51, 0.0  ;;  %v225_v57 = vmul.f32 0.03125, %v217_v55  ;;  %v245_v59 = vmul.f32 0.03125, %v237_v54 }
 0x18d   :  { %v260_v58 = vadd.f32 1e-05, %v256_v56  ;;  %v249_v60 = vmul.f32 %v225_v57, %v225_v57  ;;  %v269_v19 = vsub.f32 %v570_v32, %v225_v57 }
 0x18e   :  { %v243_v63 = vpop.xlane.xlu1 %242  ;;  %v240_v0 = vpop.xlane.xlu0 %239 }
 0x18f   :  { %414 = vrsqrt.f32 %v260_v58  ;;  %v253_v1 = vsub.f32 %v245_v59, %v249_v60  ;;  %v247_v2 = vmul.f32 0.03125, %v243_v63  ;;  %v246_v3 = vmul.f32 0.03125, %v240_v0 }
 0x191   :  { %v257_v4 = vmax.f32 %v253_v1, 0.0  ;;  %v255_v5 = vsub.f32 %v247_v2, %v251_v62  ;;  %v254_v6 = vsub.f32 %v246_v3, %v250_v61 }
 0x193   :  { %v261_v7 = vadd.f32 1e-05, %v257_v4  ;;  %v259_v8 = vmax.f32 %v255_v5, 0.0  ;;  %v258_v9 = vmax.f32 %v254_v6, 0.0 }
 0x195   :  { %416 = vrsqrt.f32 %v261_v7  ;;  %v263_v10 = vadd.f32 1e-05, %v259_v8  ;;  %v262_v11 = vadd.f32 1e-05, %v258_v9 }
 0x197   :  { %418 = vrsqrt.f32 %v263_v10 }
 0x198   :  { %420 = vrsqrt.f32 %v262_v11 }
 0x19c   :  { %v415_v13 = vpop.eup %414 }
 0x19d   :  { %v272_v15 = vmul.f32 %v415_v13, %v268_v12 }
 0x19f   :  { %v283_v17 = vmul.f32 %v355_v14, %v272_v15 }
 0x1a1   :  { %v294_v18 = vadd.f32 %v356_v16, %v283_v17 }
 0x1a2   :  { %v417_v20 = vpop.eup %416 }
 0x1a3   :  { %v361_v24 = vpack.c.bf16 %v294_v18, %v294_v18  ;;  %v273_v22 = vmul.f32 %v417_v20, %v269_v19 }
 0x1a4   :  { %v419_v25 = vpop.eup %418 }
 0x1a5   :  { %v421_v27 = vpop.eup %420  ;;  %v284_v28 = vmul.f32 %v355_v14, %v273_v22  ;;  %315 = vst.msk [vmem:[#allocation2] sm:$0xf] %vm314_vm3, %v361_v24  ;;  %v275_v29 = vmul.f32 %v419_v25, %v271_v21 }
 0x1a6   :  { %v274_v30 = vmul.f32 %v421_v27, %v270_v26 }
 0x1a7   :  { %v295_v33 = vadd.f32 %v356_v16, %v284_v28  ;;  %v286_v34 = vmul.f32 %v355_v14, %v275_v29 }
 0x1a8   :  { %v285_v35 = vmul.f32 %v355_v14, %v274_v30 }
 0x1a9   :  { %v362_v32 = vpack.c.bf16 %v295_v33, %v295_v33  ;;  %v297_v36 = vadd.f32 %v356_v16, %v286_v34 }
 0x1aa   :  { %v296_v37 = vadd.f32 %v356_v16, %v285_v35 }
 0x1ab   :  { %316 = vst.msk [vmem:[#allocation2 + $0x4] sm:$0xf] %vm314_vm3, %v362_v32  ;;  %v364_v31 = vpack.c.bf16 %v297_v36, %v297_v36 }
 0x1ac   :  { %v363_v38 = vpack.c.bf16 %v296_v37, %v296_v37 }
 0x1ad   :  { %318 = vst.msk [vmem:[#allocation2 + $0xc] sm:$0xf] %vm314_vm3, %v364_v31 }
 0x1ae   :  { %317 = vst.msk [vmem:[#allocation2 + $0x8] sm:$0xf] %vm314_vm3, %v363_v38 }
 0x1af   :  { %433 = shalt.err (!%p430_p4)
}
 0x1b0   :  { %s446_s6 = smov 64   ;;  %s447_s7 = smov 4  }
 0x1b1   :  { %330 = dma.vmem_to_hbm [thread:$0]  %s325_s4, 256, %s608_s5, [#allocation3], %s446_s6, %s446_s6, %s447_s7  }
 0x1b2   :  { %442 = dma.done.wait [#allocation3], 256  }
 0x1b3   :  { %443 = vsyncadd [#allocation3], 4294967040 }
 0x1b4   :  { %334 = vsyncpa [#allocation3], 1 }

</bundles_post_ra>
